<compile_context>
chip_gen: v5e
topology: v5e:2x2
jax: 0.10.0
libtpu: 0.0.40
codegen_flags: <defaults>
</compile_context>

<pallas_src>
import functools

import jax
import jax.numpy as jnp
from jax import lax
from jax.experimental import pallas as pl
from jax.experimental.pallas import tpu as pltpu


def _round_up(x, m):
    return ((x + m - 1) // m) * m


def _affine_kernel(params_ref, img_ref, out_ref, mean_ref, *, C, H, W, TILE):
    """One (image b, destination-pixel tile t) grid step.

    params_ref : SMEM f32[B, 6]   inverse affine matrices (scalar prefetch)
    img_ref    : VMEM [C*H, W]    whole source image, resident across t
    out_ref    : VMEM [C, TILE]   flat destination-pixel tile (lane dense)
    mean_ref   : VMEM f32[C, 1]   per-channel fill value scratch
    """
    b = pl.program_id(0)
    t = pl.program_id(1)

    # ---- per-channel spatial mean == img.mean(axis=(1, 2)) (fill value) ----
    # computed once per image (f32 accumulation), reused by every dst tile.
    @pl.when(t == 0)
    def _():
        imf = img_ref[...].astype(jnp.float32)                       # (C*H, W)
        rowsum = jnp.sum(imf, axis=1, keepdims=True)                 # (C*H, 1)
        parts = [jnp.sum(rowsum[c * H:(c + 1) * H, :], axis=0, keepdims=True)
                 for c in range(C)]
        mean_ref[...] = jnp.concatenate(parts, axis=0) * (1.0 / (H * W))

    m0 = params_ref[b, 0]
    m1 = params_ref[b, 1]
    m2 = params_ref[b, 2]
    m3 = params_ref[b, 3]
    m4 = params_ref[b, 4]
    m5 = params_ref[b, 5]

    # ---- destination pixel coordinates for this tile (int32 end-to-end) ----
    p = t * TILE + lax.broadcasted_iota(jnp.int32, (1, TILE), 1)     # (1, TILE)
    # exact divmod by W: f32 estimate + integer +-1 correction (no vector idiv)
    q = jnp.floor(p.astype(jnp.float32) * (1.0 / W)).astype(jnp.int32)
    q = jnp.where(q * W > p, q - 1, q)
    q = jnp.where((q + 1) * W <= p, q + 1, q)
    row = q
    col = p - q * W
    xc = col.astype(jnp.float32) - (W - 1) * 0.5                     # centered coords
    yc = row.astype(jnp.float32) - (H - 1) * 0.5

    # ---- inverse map to source coords (grid_sample, align_corners=False) ----
    src_x = m0 * xc + m1 * yc + m2 + (W - 1) * 0.5
    src_y = m3 * xc + m4 * yc + m5 + (H - 1) * 0.5
    ix_f = jnp.round(src_x)                                          # nearest, half-to-even
    iy_f = jnp.round(src_y)                                          # (== torch nearbyint)
    in_bounds = ((ix_f >= 0.0) & (ix_f <= W - 1.0) &
                 (iy_f >= 0.0) & (iy_f <= H - 1.0))                  # (1, TILE)
    ix = jnp.clip(ix_f, 0.0, W - 1.0).astype(jnp.int32)              # (1, TILE)
    iy = jnp.clip(iy_f, 0.0, H - 1.0).astype(jnp.int32)

    # ---- separable one-hot selectors: (H + W) * TILE compares, not HW*TILE ----
    img = img_ref[...]                                               # (C*H, W)
    if img.dtype not in (jnp.dtype(jnp.float32), jnp.dtype(jnp.bfloat16)):
        img = img.astype(jnp.float32)                                # MXU-safe dtype
    gdt = img.dtype
    col_sel = (lax.broadcasted_iota(jnp.int32, (W, TILE), 0) == ix
               ).astype(gdt)                                         # (W, TILE)
    row_sel = (lax.broadcasted_iota(jnp.int32, (H, TILE), 0) == iy
               ).astype(jnp.float32)                                 # (H, TILE)

    # ---- column gather on the MXU: colg[c*H + h, d] = img[c, h, ix[d]] ----
    colg = jnp.dot(img, col_sel, preferred_element_type=jnp.float32)  # (C*H, TILE)

    # ---- row select (VPU multiply + sublane reduce), one fused OOB fill ----
    gathered = jnp.concatenate(
        [jnp.sum(colg[c * H:(c + 1) * H, :] * row_sel, axis=0, keepdims=True)
         for c in range(C)], axis=0)                                 # (C, TILE)
    out_ref[...] = jnp.where(in_bounds, gathered,
                             mean_ref[...]).astype(out_ref.dtype)


def _sample_inverse_matrix(key, *, degrees, translate, scale_range, shear,
                           width, height):
    """torchvision RandomAffine.get_params + _get_inverse_affine_matrix
    (center=(0,0), tensor path), using the JAX PRNG."""
    k1, k2, k3, k4, k5 = jax.random.split(key, 5)
    angle = jax.random.uniform(k1, (), minval=-degrees, maxval=degrees)
    max_dx = translate[0] * width
    max_dy = translate[1] * height
    tx = jnp.round(jax.random.uniform(k2, (), minval=-max_dx, maxval=max_dx))
    ty = jnp.round(jax.random.uniform(k3, (), minval=-max_dy, maxval=max_dy))
    scale = jax.random.uniform(k4, (), minval=scale_range[0], maxval=scale_range[1])
    shear_x = jax.random.uniform(k5, (), minval=-shear, maxval=shear)

    rot = jnp.deg2rad(angle)
    sx = jnp.deg2rad(shear_x)
    sy = jnp.float32(0.0)
    a = jnp.cos(rot - sy) / jnp.cos(sy)
    b = -jnp.cos(rot - sy) * jnp.tan(sx) / jnp.cos(sy) - jnp.sin(rot)
    c = jnp.sin(rot - sy) / jnp.cos(sy)
    d = -jnp.sin(rot - sy) * jnp.tan(sx) / jnp.cos(sy) + jnp.cos(rot)
    m0 = d / scale
    m1 = -b / scale
    m3 = -c / scale
    m4 = a / scale
    m2 = m0 * (-tx) + m1 * (-ty)
    m5 = m3 * (-tx) + m4 * (-ty)
    return jnp.stack([m0, m1, m2, m3, m4, m5]).astype(jnp.float32)


def random_affine_batch(imgs, key, *, degrees=30.0, translate=(0.1, 0.1),
                        scale=(0.8, 1.2), shear=10.0, tile=512):
    """Apply RandomAffine.forward independently to each image of a (B,C,H,W) batch."""
    B, C, H, W = imgs.shape
    keys = jax.random.split(key, B)
    sample = functools.partial(_sample_inverse_matrix, degrees=degrees,
                               translate=translate, scale_range=scale,
                               shear=shear, width=W, height=H)
    params = jax.vmap(sample)(keys)                                  # (B, 6) f32

    HW = H * W
    TILE = min(int(tile), _round_up(HW, 128))                        # lane-dense dst tile
    HW_pad = _round_up(HW, TILE)                                     # pad, crop afterwards
    n_tiles = HW_pad // TILE

    # merge (C, H) so the MXU LHS / vreg sublanes are well filled (layout plumbing)
    img2 = imgs.reshape(B, C * H, W)

    # explicit VMEM budget (v7x has 64 MiB physical / 32 MiB default scoped)
    in_b = jnp.dtype(imgs.dtype).itemsize
    f32b = 4
    img_block = C * H * W * in_b
    out_block = C * TILE * in_b
    work = (C * H + 2 * H + 2 * W + 8) * TILE * f32b
    vmem_limit = int(min(48 * 2**20,
                         max(8 * 2**20, 2 * (2 * img_block + 2 * out_block + work))))

    kernel = functools.partial(_affine_kernel, C=C, H=H, W=W, TILE=TILE)
    out_flat = pl.pallas_call(
        kernel,
        out_shape=jax.ShapeDtypeStruct((B, C, HW_pad), imgs.dtype),
        grid_spec=pltpu.PrefetchScalarGridSpec(
            num_scalar_prefetch=1,                                   # params -> SMEM
            grid=(B, n_tiles),
            in_specs=[
                pl.BlockSpec((None, C * H, W), lambda b, t, prm: (b, 0, 0)),
            ],
            out_specs=pl.BlockSpec((None, C, TILE), lambda b, t, prm: (b, 0, t)),
            scratch_shapes=[pltpu.VMEM((C, 1), jnp.float32)],
        ),
        compiler_params=pltpu.CompilerParams(
            dimension_semantics=("parallel", "arbitrary"),
            vmem_limit_bytes=vmem_limit,
        ),
    )(params, img2)

    return out_flat[:, :, :HW].reshape(B, C, H, W)


def random_affine(img, key, *, degrees=30.0, translate=(0.1, 0.1),
                  scale=(0.8, 1.2), shear=10.0):
    """RandomAffine.forward for a single CHW image: fill = per-channel mean,
    then affine warp (NEAREST)."""
    return random_affine_batch(img[None], key, degrees=degrees,
                               translate=translate, scale=scale, shear=shear)[0]


if __name__ == "__main__":
    key = jax.random.PRNGKey(0)
    k_img, k_aff, k_aff2 = jax.random.split(key, 3)

    # batched CHW images: batch=2, channels=4, spatial 16x16
    imgs = jax.random.uniform(k_img, (2, 4, 16, 16), dtype=jnp.float32)

    out = random_affine_batch(imgs, k_aff, degrees=30.0, translate=(0.1, 0.1),
                              scale=(0.8, 1.2), shear=10.0)
    out = jax.block_until_ready(out)
    assert out.shape == imgs.shape and out.dtype == imgs.dtype
    assert bool(jnp.all(jnp.isfinite(out)))

    # module-faithful single-image call (CHW), as in RandomAffine.forward
    single = random_affine(imgs[0], k_aff2)
    single = jax.block_until_ready(single)
    assert single.shape == imgs.shape[1:] and single.dtype == imgs.dtype
    assert bool(jnp.all(jnp.isfinite(single)))

    print("KERNEL_OK")
</pallas_src>

<mosaic_0001>
module attributes {stable_mosaic.version = 11 : i64} {
  func.func @_affine_kernel(%arg0: i32, %arg1: i32, %arg2: memref<2x6xf32, #tpu.memory_space<smem>>, %arg3: memref<1x64x16xf32, #tpu.memory_space<vmem>>, %arg4: memref<1x4x256xf32, #tpu.memory_space<vmem>>, %arg5: memref<4x1xf32, #tpu.memory_space<vmem>>) attributes {dimension_semantics = [#tpu.dimension_semantics<parallel>, #tpu.dimension_semantics<arbitrary>], iteration_bounds = array<i64: 2, 1>, scalar_prefetch = 1 : i64, scratch_operands = 1 : i64, tpu.core_type = #tpu.core_type<tc>, window_params = [{transform_indices = @transform_0, window_bounds = array<i64: 1, 64, 16>}, {transform_indices = @transform_1, window_bounds = array<i64: 1, 4, 256>}]} {
    %c0_i32 = arith.constant 0 : i32
    %0 = arith.cmpi eq, %arg1, %c0_i32 : i32
    %1 = arith.extui %0 : i1 to i32
    %c0_i32_0 = arith.constant 0 : i32
    %2 = arith.cmpi ne, %1, %c0_i32_0 : i32
    scf.if %2 {
      %c0_30 = arith.constant 0 : index
      %c0_31 = arith.constant 0 : index
      %c0_32 = arith.constant 0 : index
      %127 = vector.load %arg3[%c0_30, %c0_31, %c0_32] : memref<1x64x16xf32, #tpu.memory_space<vmem>>, vector<1x64x16xf32>
      %128 = vector.shape_cast %127 : vector<1x64x16xf32> to vector<64x16xf32>
      %cst_33 = arith.constant dense<0.000000e+00> : vector<64xf32>
      %129 = vector.multi_reduction <add>, %128, %cst_33 [1] : vector<64x16xf32> to vector<64xf32>
      %130 = vector.shape_cast %129 : vector<64xf32> to vector<64x1xf32>
      %131 = vector.extract_strided_slice %130 {offsets = [0, 0], sizes = [16, 1], strides = [1, 1]} : vector<64x1xf32> to vector<16x1xf32>
      %cst_34 = arith.constant dense<0.000000e+00> : vector<1xf32>
      %132 = vector.multi_reduction <add>, %131, %cst_34 [0] : vector<16x1xf32> to vector<1xf32>
      %133 = vector.shape_cast %132 : vector<1xf32> to vector<1x1xf32>
      %134 = vector.extract_strided_slice %130 {offsets = [16, 0], sizes = [16, 1], strides = [1, 1]} : vector<64x1xf32> to vector<16x1xf32>
      %cst_35 = arith.constant dense<0.000000e+00> : vector<1xf32>
      %135 = vector.multi_reduction <add>, %134, %cst_35 [0] : vector<16x1xf32> to vector<1xf32>
      %136 = vector.shape_cast %135 : vector<1xf32> to vector<1x1xf32>
      %137 = vector.extract_strided_slice %130 {offsets = [32, 0], sizes = [16, 1], strides = [1, 1]} : vector<64x1xf32> to vector<16x1xf32>
      %cst_36 = arith.constant dense<0.000000e+00> : vector<1xf32>
      %138 = vector.multi_reduction <add>, %137, %cst_36 [0] : vector<16x1xf32> to vector<1xf32>
      %139 = vector.shape_cast %138 : vector<1xf32> to vector<1x1xf32>
      %140 = vector.extract_strided_slice %130 {offsets = [48, 0], sizes = [16, 1], strides = [1, 1]} : vector<64x1xf32> to vector<16x1xf32>
      %cst_37 = arith.constant dense<0.000000e+00> : vector<1xf32>
      %141 = vector.multi_reduction <add>, %140, %cst_37 [0] : vector<16x1xf32> to vector<1xf32>
      %142 = vector.shape_cast %141 : vector<1xf32> to vector<1x1xf32>
      %143 = tpu.concatenate %133, %136, %139, %142 in 0 : vector<1x1xf32>, vector<1x1xf32>, vector<1x1xf32>, vector<1x1xf32> -> vector<4x1xf32>
      %cst_38 = arith.constant 3.906250e-03 : f32
      %144 = vector.broadcast %cst_38 : f32 to vector<4x1xf32>
      %145 = arith.mulf %143, %144 : vector<4x1xf32>
      %c0_39 = arith.constant 0 : index
      %c0_40 = arith.constant 0 : index
      %146 = vector.load %arg5[%c0_39, %c0_40] : memref<4x1xf32, #tpu.memory_space<vmem>>, vector<4x1xf32>
      tpu.vector_store %arg5[%c0_39, %c0_40], %145 {strides = array<i32>} : memref<4x1xf32, #tpu.memory_space<vmem>>, vector<4x1xf32>,
    } else {
    }
    %3 = arith.index_cast %arg0 : i32 to index
    %c0 = arith.constant 0 : index
    %4 = memref.load %arg2[%3, %c0] : memref<2x6xf32, #tpu.memory_space<smem>>
    %5 = arith.index_cast %arg0 : i32 to index
    %c1 = arith.constant 1 : index
    %6 = memref.load %arg2[%5, %c1] : memref<2x6xf32, #tpu.memory_space<smem>>
    %7 = arith.index_cast %arg0 : i32 to index
    %c2 = arith.constant 2 : index
    %8 = memref.load %arg2[%7, %c2] : memref<2x6xf32, #tpu.memory_space<smem>>
    %9 = arith.index_cast %arg0 : i32 to index
    %c3 = arith.constant 3 : index
    %10 = memref.load %arg2[%9, %c3] : memref<2x6xf32, #tpu.memory_space<smem>>
    %11 = arith.index_cast %arg0 : i32 to index
    %c4 = arith.constant 4 : index
    %12 = memref.load %arg2[%11, %c4] : memref<2x6xf32, #tpu.memory_space<smem>>
    %13 = arith.index_cast %arg0 : i32 to index
    %c5 = arith.constant 5 : index
    %14 = memref.load %arg2[%13, %c5] : memref<2x6xf32, #tpu.memory_space<smem>>
    %c256_i32 = arith.constant 256 : i32
    %15 = arith.muli %arg1, %c256_i32 : i32
    %16 = tpu.iota {dimensions = array<i32: 1>} : vector<1x256xi32>
    %17 = vector.broadcast %15 : i32 to vector<1x256xi32>
    %18 = arith.addi %17, %16 : vector<1x256xi32>
    %19 = arith.sitofp %18 : vector<1x256xi32> to vector<1x256xf32>
    %cst = arith.constant 6.250000e-02 : f32
    %20 = vector.broadcast %cst : f32 to vector<1x256xf32>
    %21 = arith.mulf %19, %20 : vector<1x256xf32>
    %22 = math.floor %21 : vector<1x256xf32>
    %23 = arith.fptosi %22 : vector<1x256xf32> to vector<1x256xi32>
    %c16_i32 = arith.constant 16 : i32
    %24 = vector.broadcast %c16_i32 : i32 to vector<1x256xi32>
    %25 = arith.muli %23, %24 : vector<1x256xi32>
    %26 = arith.cmpi sgt, %25, %18 : vector<1x256xi32>
    %c1_i32 = arith.constant 1 : i32
    %27 = vector.broadcast %c1_i32 : i32 to vector<1x256xi32>
    %28 = arith.subi %23, %27 : vector<1x256xi32>
    %29 = arith.select %26, %28, %23 : vector<1x256xi1>, vector<1x256xi32>
    %c1_i32_1 = arith.constant 1 : i32
    %30 = vector.broadcast %c1_i32_1 : i32 to vector<1x256xi32>
    %31 = arith.addi %29, %30 : vector<1x256xi32>
    %c16_i32_2 = arith.constant 16 : i32
    %32 = vector.broadcast %c16_i32_2 : i32 to vector<1x256xi32>
    %33 = arith.muli %31, %32 : vector<1x256xi32>
    %34 = arith.cmpi sle, %33, %18 : vector<1x256xi32>
    %c1_i32_3 = arith.constant 1 : i32
    %35 = vector.broadcast %c1_i32_3 : i32 to vector<1x256xi32>
    %36 = arith.addi %29, %35 : vector<1x256xi32>
    %37 = arith.select %34, %36, %29 : vector<1x256xi1>, vector<1x256xi32>
    %c16_i32_4 = arith.constant 16 : i32
    %38 = vector.broadcast %c16_i32_4 : i32 to vector<1x256xi32>
    %39 = arith.muli %37, %38 : vector<1x256xi32>
    %40 = arith.subi %18, %39 : vector<1x256xi32>
    %41 = arith.sitofp %40 : vector<1x256xi32> to vector<1x256xf32>
    %cst_5 = arith.constant 7.500000e+00 : f32
    %42 = vector.broadcast %cst_5 : f32 to vector<1x256xf32>
    %43 = arith.subf %41, %42 : vector<1x256xf32>
    %44 = arith.sitofp %37 : vector<1x256xi32> to vector<1x256xf32>
    %cst_6 = arith.constant 7.500000e+00 : f32
    %45 = vector.broadcast %cst_6 : f32 to vector<1x256xf32>
    %46 = arith.subf %44, %45 : vector<1x256xf32>
    %47 = vector.broadcast %4 : f32 to vector<1x256xf32>
    %48 = arith.mulf %47, %43 : vector<1x256xf32>
    %49 = vector.broadcast %6 : f32 to vector<1x256xf32>
    %50 = arith.mulf %49, %46 : vector<1x256xf32>
    %51 = arith.addf %48, %50 : vector<1x256xf32>
    %52 = vector.broadcast %8 : f32 to vector<1x256xf32>
    %53 = arith.addf %51, %52 : vector<1x256xf32>
    %cst_7 = arith.constant 7.500000e+00 : f32
    %54 = vector.broadcast %cst_7 : f32 to vector<1x256xf32>
    %55 = arith.addf %53, %54 : vector<1x256xf32>
    %56 = vector.broadcast %10 : f32 to vector<1x256xf32>
    %57 = arith.mulf %56, %43 : vector<1x256xf32>
    %58 = vector.broadcast %12 : f32 to vector<1x256xf32>
    %59 = arith.mulf %58, %46 : vector<1x256xf32>
    %60 = arith.addf %57, %59 : vector<1x256xf32>
    %61 = vector.broadcast %14 : f32 to vector<1x256xf32>
    %62 = arith.addf %60, %61 : vector<1x256xf32>
    %cst_8 = arith.constant 7.500000e+00 : f32
    %63 = vector.broadcast %cst_8 : f32 to vector<1x256xf32>
    %64 = arith.addf %62, %63 : vector<1x256xf32>
    %65 = math.roundeven %55 : vector<1x256xf32>
    %66 = math.roundeven %64 : vector<1x256xf32>
    %cst_9 = arith.constant 0.000000e+00 : f32
    %67 = vector.broadcast %cst_9 : f32 to vector<1x256xf32>
    %68 = arith.cmpf oge, %65, %67 : vector<1x256xf32>
    %cst_10 = arith.constant 1.500000e+01 : f32
    %69 = vector.broadcast %cst_10 : f32 to vector<1x256xf32>
    %70 = arith.cmpf ole, %65, %69 : vector<1x256xf32>
    %71 = arith.andi %68, %70 : vector<1x256xi1>
    %cst_11 = arith.constant 0.000000e+00 : f32
    %72 = vector.broadcast %cst_11 : f32 to vector<1x256xf32>
    %73 = arith.cmpf oge, %66, %72 : vector<1x256xf32>
    %74 = arith.andi %71, %73 : vector<1x256xi1>
    %cst_12 = arith.constant 1.500000e+01 : f32
    %75 = vector.broadcast %cst_12 : f32 to vector<1x256xf32>
    %76 = arith.cmpf ole, %66, %75 : vector<1x256xf32>
    %77 = arith.andi %74, %76 : vector<1x256xi1>
    %cst_13 = arith.constant 0.000000e+00 : f32
    %cst_14 = arith.constant 1.500000e+01 : f32
    %78 = vector.broadcast %cst_13 : f32 to vector<1x256xf32>
    %79 = arith.maximumf %78, %65 : vector<1x256xf32>
    %80 = vector.broadcast %cst_14 : f32 to vector<1x256xf32>
    %81 = arith.minimumf %80, %79 : vector<1x256xf32>
    %82 = arith.fptosi %81 : vector<1x256xf32> to vector<1x256xi32>
    %cst_15 = arith.constant 0.000000e+00 : f32
    %cst_16 = arith.constant 1.500000e+01 : f32
    %83 = vector.broadcast %cst_15 : f32 to vector<1x256xf32>
    %84 = arith.maximumf %83, %66 : vector<1x256xf32>
    %85 = vector.broadcast %cst_16 : f32 to vector<1x256xf32>
    %86 = arith.minimumf %85, %84 : vector<1x256xf32>
    %87 = arith.fptosi %86 : vector<1x256xf32> to vector<1x256xi32>
    %c0_17 = arith.constant 0 : index
    %c0_18 = arith.constant 0 : index
    %c0_19 = arith.constant 0 : index
    %88 = vector.load %arg3[%c0_17, %c0_18, %c0_19] : memref<1x64x16xf32, #tpu.memory_space<vmem>>, vector<1x64x16xf32>
    %89 = vector.shape_cast %88 : vector<1x64x16xf32> to vector<64x16xf32>
    %90 = tpu.iota {dimensions = array<i32: 0>} : vector<16x256xi32>
    %91 = vector.broadcast %82 : vector<1x256xi32> to vector<16x256xi32>
    %92 = arith.cmpi eq, %90, %91 : vector<16x256xi32>
    %93 = arith.extui %92 : vector<16x256xi1> to vector<16x256xi32>
    %94 = arith.sitofp %93 : vector<16x256xi32> to vector<16x256xf32>
    %95 = tpu.iota {dimensions = array<i32: 0>} : vector<16x256xi32>
    %96 = vector.broadcast %87 : vector<1x256xi32> to vector<16x256xi32>
    %97 = arith.cmpi eq, %95, %96 : vector<16x256xi32>
    %98 = arith.extui %97 : vector<16x256xi1> to vector<16x256xi32>
    %99 = arith.sitofp %98 : vector<16x256xi32> to vector<16x256xf32>
    %cst_20 = arith.constant dense<0.000000e+00> : vector<64x256xf32>
    %100 = tpu.matmul %89, %94, %cst_20 {dimension_numbers = #tpu.dot_dimension_numbers<[1], [0], [0], [1], [0, 0, 1, 1], [], []>} : vector<64x16xf32>, vector<16x256xf32>, vector<64x256xf32> -> vector<64x256xf32>
    %101 = vector.extract_strided_slice %100 {offsets = [0, 0], sizes = [16, 256], strides = [1, 1]} : vector<64x256xf32> to vector<16x256xf32>
    %102 = arith.mulf %101, %99 : vector<16x256xf32>
    %cst_21 = arith.constant dense<0.000000e+00> : vector<256xf32>
    %103 = vector.multi_reduction <add>, %102, %cst_21 [0] : vector<16x256xf32> to vector<256xf32>
    %104 = vector.shape_cast %103 : vector<256xf32> to vector<1x256xf32>
    %105 = vector.extract_strided_slice %100 {offsets = [16, 0], sizes = [16, 256], strides = [1, 1]} : vector<64x256xf32> to vector<16x256xf32>
    %106 = arith.mulf %105, %99 : vector<16x256xf32>
    %cst_22 = arith.constant dense<0.000000e+00> : vector<256xf32>
    %107 = vector.multi_reduction <add>, %106, %cst_22 [0] : vector<16x256xf32> to vector<256xf32>
    %108 = vector.shape_cast %107 : vector<256xf32> to vector<1x256xf32>
    %109 = vector.extract_strided_slice %100 {offsets = [32, 0], sizes = [16, 256], strides = [1, 1]} : vector<64x256xf32> to vector<16x256xf32>
    %110 = arith.mulf %109, %99 : vector<16x256xf32>
    %cst_23 = arith.constant dense<0.000000e+00> : vector<256xf32>
    %111 = vector.multi_reduction <add>, %110, %cst_23 [0] : vector<16x256xf32> to vector<256xf32>
    %112 = vector.shape_cast %111 : vector<256xf32> to vector<1x256xf32>
    %113 = vector.extract_strided_slice %100 {offsets = [48, 0], sizes = [16, 256], strides = [1, 1]} : vector<64x256xf32> to vector<16x256xf32>
    %114 = arith.mulf %113, %99 : vector<16x256xf32>
    %cst_24 = arith.constant dense<0.000000e+00> : vector<256xf32>
    %115 = vector.multi_reduction <add>, %114, %cst_24 [0] : vector<16x256xf32> to vector<256xf32>
    %116 = vector.shape_cast %115 : vector<256xf32> to vector<1x256xf32>
    %117 = tpu.concatenate %104, %108, %112, %116 in 0 : vector<1x256xf32>, vector<1x256xf32>, vector<1x256xf32>, vector<1x256xf32> -> vector<4x256xf32>
    %c0_25 = arith.constant 0 : index
    %c0_26 = arith.constant 0 : index
    %118 = vector.load %arg5[%c0_25, %c0_26] : memref<4x1xf32, #tpu.memory_space<vmem>>, vector<4x1xf32>
    %119 = vector.shape_cast %77 : vector<1x256xi1> to vector<1x256xi1>
    %120 = vector.broadcast %119 : vector<1x256xi1> to vector<4x256xi1>
    %121 = vector.shape_cast %118 : vector<4x1xf32> to vector<4x1xf32>
    %122 = vector.broadcast %121 : vector<4x1xf32> to vector<4x256xf32>
    %123 = arith.select %120, %117, %122 : vector<4x256xi1>, vector<4x256xf32>
    %c0_27 = arith.constant 0 : index
    %c0_28 = arith.constant 0 : index
    %c0_29 = arith.constant 0 : index
    %124 = vector.load %arg4[%c0_27, %c0_28, %c0_29] : memref<1x4x256xf32, #tpu.memory_space<vmem>>, vector<1x4x256xf32>
    %125 = vector.shape_cast %124 : vector<1x4x256xf32> to vector<4x256xf32>
    %126 = vector.shape_cast %123 : vector<4x256xf32> to vector<1x4x256xf32>
    tpu.vector_store %arg4[%c0_27, %c0_28, %c0_29], %126 {strides = array<i32>} : memref<1x4x256xf32, #tpu.memory_space<vmem>>, vector<1x4x256xf32>,
    return
  }
  func.func @transform_0(%arg0: i32, %arg1: i32, %arg2: memref<2x6xf32, #tpu.memory_space<smem>>) -> (i32, i32, i32) {
    %c0_i32 = arith.constant 0 : i32
    %c0_i32_0 = arith.constant 0 : i32
    %c0_i32_1 = arith.constant 0 : i32
    return %arg0, %c0_i32, %c0_i32_0 : i32, i32, i32
  }
  func.func @transform_1(%arg0: i32, %arg1: i32, %arg2: memref<2x6xf32, #tpu.memory_space<smem>>) -> (i32, i32, i32) {
    %c0_i32 = arith.constant 0 : i32
    %c0_i32_0 = arith.constant 0 : i32
    return %arg0, %c0_i32, %arg1 : i32, i32, i32
  }
}

</mosaic_0001>

<bundles_post_ra>
// kernel: tpu_custom_call.1
= control target key start
LH: loop header
LB: loop body
LE: loop exit
PB: predicated region body
PF: predicated region fallthrough
CT: control target
= control target key end

     0   :  { %s924_s12 = smov [#allocation4]   ;;  %s1225_s0 = inlined_call_operand.vmem [shape: f32[2,6], index: 0, kind: input, shape index: {}]   ;;  %s1226_s1 = inlined_call_operand.vmem [shape: f32[2,64,16], index: 1, kind: input, shape index: {}]   ;;  %s1227_s2 = inlined_call_operand.hbm [shape: f32[2,4,256], index: 2, kind: output, shape index: {}]  }
   0x1   :  { %s8_s11 = sshll.u32 %s1225_s0, 4  ;;  %s9_s11 = int_to_ptr.vmem [resolvable:$true] %s8_s11 }
   0x2   :  { %11 = dma.vmem_to_smem %s9_s11, 32, %s924_s12, [#allocation3] }
   0x3   :  { %894 = dma.done.wait [#allocation3], 32 }
   0x4   :  { %895 = vsyncadd [#allocation3], 4294967264 }
   0x5   :  { %14 = sfence }
   0x6   :  { %15 = vsyncpa [#allocation6], 0 }
   0x7   :  { %17 = vsyncpa [#allocation6 + $0x1], 0  ;;  %s946_s13 = smov 0   ;;  %s948_s14 = smov 0  }
   0x8   :  { %s950_s15 = smov 0   ;;  %s952_s16 = smov 0  }
   0x9   :  { %s954_s17 = smov 0   ;;  %s956_s18 = smov 0  }
   0xa LB: > { %s655_s0 = sadd.s32 4294967295, %s922_s18   ;;  %s656_s19 = sadd.s32 4294967294, %s922_s18   ;;  %s922_s18 = sphi %s956_s18, %s23_s18   ;;  %s918_s17 = sphi %s954_s17, %s1236_s17   ;;  %s914_s16 = sphi %s952_s16, %s1235_s16   ;;  %s910_s15 = sphi %s950_s15, %s1234_s15   ;;  %s906_s14 = sphi %s948_s14, %s1233_s14   ;;  %s902_s13 = sphi %s946_s13, %s1232_s13  }
   0xb   : > { %s35_s20 = sadd.s32 1, %s918_s17  ;;  %s70_s21 = sadd.s32 1, %s910_s15 }
   0xc   : > { %p37_p0 = scmp.ge.s32.totalorder %s35_s20, 2  ;;  %p80_p1 = scmp.ne.s32.totalorder %s910_s15, %s906_s14 }
   0xd   : > { %p81_p2 = scmp.eq.s32.totalorder %s655_s0, 1  ;;  %p86_p3 = scmp.ne.s32.totalorder %s906_s14, %s902_s13 }
   0xe   : > { %s1238_s20 = smov (%p37_p0, %s35_s20), 0  ;;  %p87_p5 = scmp.eq.s32.totalorder %s656_s19, 1 }
   0xf   : > { %p986_p4 = por %p81_p2, %p80_p1  ;;  %s65_s23 = ssub.s32 %s918_s17, %s1238_s20 }
  0x10   : > { %p659_p6 = scmp.ge.s32.totalorder %s922_s18, 1  ;;  %p68_p7 = scmp.eq.s32.totalorder %s65_s23, 0 }
  0x11   : > { %p993_p8 = por %p87_p5, %p86_p3  ;;  %p113_p9 = scmp.lt.s32.totalorder %s922_s18, 3 }
  0x12   : > { %s999_s25 = scalar_select %p68_p7, %s910_s15, %s70_s21  }
  0x13   : > { %p114_p10 = pnand %p659_p6, %p113_p9 }
  0x14   : > { %p133_p11 = scmp.lt.s32.totalorder (!%p114_p10), %s914_s16, 1  ;;  %s1047_s3 = sshll.u32 (!%p114_p10), %s914_s16, 7 }
  0x15   : > { %117 = sbr.rel (%p114_p10) target bundleno = 288 (0x120), region = 24  ;;  %s221_s4 = sadd.s32 (!%p114_p10), 4, %s1047_s3 }
  0x16   : > { %s215_s5 = sadd.s32 (!%p114_p10), 1, %s1047_s3  ;;  %s1056_s6 = sld [smem:[#allocation4 + %s221_s4]] (!%p114_p10) }
  0x17   : > { %s219_s7 = sadd.s32 (!%p114_p10), 3, %s1047_s3  ;;  %s1062_s8 = sld [smem:[#allocation4 + %s215_s5]] (!%p114_p10) }
  0x18   : > { %s1067_s9 = sld [smem:[#allocation4 + %s1047_s3]] (!%p114_p10)  ;;  %s217_s11 = sadd.s32 (!%p114_p10), 2, %s1047_s3 }
  0x19   : > { %s1072_s10 = sld [smem:[#allocation4 + %s219_s7]] (!%p114_p10)  ;;  %s223_s0 = sadd.s32 (!%p114_p10), 5, %s1047_s3 }
  0x1a   : > { %v226_v0 = vlaneseq  ;;  %s134_s26 = scalar_select %p133_p11, %s914_s16, 1  ;;  %vm151_vm0 = vcmask 130048   ;;  %vm204_vm9 = vcmask 1040384   ;;  %vm206_vm10 = vcmask 1041408  }
  0x1b   : > { %s218_s12 = sld [smem:[#allocation4 + %s217_s11]]  ;;  %vm208_vm11 = vcmask 1042432   ;;  %vm211_vm12 = vcmask 3072   ;;  %s130_s21 = sand.u32 1, %s906_s14  }
  0x1c   : > { %v1004_v1 = vand.u32 127, %v226_v0  ;;  %s715_s27 = sshll.u32 %s134_s26, 6  ;;  %v284_v45 = vstv %s1056_s6  ;;  %s1137_s19 = sld [smem:[#allocation4 + %s223_s0]] }
  0x1d   : > { %s1013_s30 = scalar_lea.vmem %s1226_s1, %s715_s27  ;;  %v271_v49 = vstv %s1062_s8  ;;  %s660_s23 = sshll.u32 %s130_s21, 3 }
  0x1e   : > { %v1007_v2 = vadd.s32 128, %v1004_v1  ;;  %v232_v3 = vcvt.s32.f32 %v1004_v1  ;;  %v1016_v4 = vld [vmem:[%s1013_s30 + $0x20] sm:$0xff]  ;;  %v1019_v5 = vld [vmem:[%s1013_s30 + $0x10] sm:$0xff]  ;;  %v1032_v14 = vld [vmem:[%s1013_s30 + $0x28] sm:$0xff]  ;;  %v268_v55 = vstv %s1067_s9  ;;  %s716_s26 = sshll.u32 %s914_s16, 3  ;;  %s132_s16 = scalar_lea.vmem [#allocation5], %s660_s23 }
  0x1f   : > { %v1022_v6 = vld [vmem:[%s1013_s30] sm:$0xff]  ;;  %v164_v9 = vsel %vm151_vm0, %v1016_v4, 0.0  ;;  %v158_v10 = vsel %vm151_vm0, %v1019_v5, 0.0  ;;  %v1035_v15 = vld [vmem:[%s1013_s30 + $0x18] sm:$0xff]  ;;  %v1038_v17 = vld [vmem:[%s1013_s30 + $0x8] sm:$0xff]  ;;  %v167_v21 = vsel %vm151_vm0, %v1032_v14, 0.0  ;;  %v281_v56 = vstv %s1072_s10  ;;  %s580_s29 = scalar_lea.hbm %s1227_s2, %s716_s26 }
  0x20   : > { %v233_v7 = vcvt.s32.f32 %v1007_v2  ;;  %v234_v8 = vmul.f32 0.0625, %v232_v3  ;;  %v152_v11 = vsel %vm151_vm0, %v1022_v6, 0.0  ;;  %165 = vadd.xlane.f32.xlu2 %v164_v9  ;;  %159 = vadd.xlane.f32.xlu1 %v158_v10  ;;  %v161_v22 = vsel %vm151_vm0, %v1035_v15, 0.0  ;;  %v1054_v29 = vld [vmem:[%s1013_s30 + $0x38] sm:$0xff]  ;;  %v1059_v31 = vld [vmem:[%s1013_s30 + $0x30] sm:$0xff]  ;;  %s582_s30 = sshll.u32 %s132_s16, 4  ;;  %s583_s30 = int_to_ptr.vmem [resolvable:$true] %s582_s30 }
  0x21   : > { %153 = vadd.xlane.f32.xlu0 %v152_v11  ;;  %v155_v24 = vsel %vm151_vm0, %v1038_v17, 0.0  ;;  %v173_v34 = vsel %vm151_vm0, %v1054_v29, 0.0  ;;  %v170_v36 = vsel %vm151_vm0, %v1059_v31, 0.0  ;;  %v1093_v10 = vshrl.u32 %v226_v0, 7  ;;  %s584_s3 = sshll.u32 %s580_s29, 4  ;;  %s567_s4 = scalar_lea.sflag [#allocation6], %s130_s21  ;;  %s585_s3 = int_to_ptr.hbm [resolvable:$true] %s584_s3 }
  0x22   : > { %v236_v12 = vfloor.f32 %v234_v8  ;;  %v235_v13 = vmul.f32 0.0625, %v233_v7  ;;  %s856_s5 = sshra.s32 %s585_s3, 4  ;;  %s862_s9 = scalar_lea.hbm %s1227_s2, 16  ;;  %s857_s5 = int_to_ptr.hbm [resolvable:$true] %s856_s5 }
  0x23   : > { %s858_s6 = scalar_lea.hbm %s857_s5, 8  ;;  %p863_p1 = scmp.lt.s32.totalorder %s857_s5, %s1227_s2 }
  0x24   : > { %v722_v16 = vcvt.f32.s32 %v236_v12  ;;  %v237_v18 = vfloor.f32 %v235_v13  ;;  %p859_p12 = scmp.ne.s32.totalorder %s857_s5, %s858_s6  ;;  %p864_p2 = scmp.lt.s32.totalorder %s862_s9, %s858_s6 }
  0x26   : > { %v240_v19 = vmul.u32 16, %v722_v16  ;;  %v664_v20 = vadd.s32 4294967295, %v722_v16  ;;  %v724_v23 = vcvt.f32.s32 %v237_v18  ;;  %v1098_v18 = vadd.s32 8, %v1093_v10  ;;  %p860_p13 = pnand %p859_p12, %p986_p4  ;;  %p865_p3 = por %p864_p2, %p863_p1 }
  0x28   : > { %vm242_vm1 = vcmp.gt.s32.totalorder %v240_v19, %v1004_v1  ;;  %v241_v25 = vmul.u32 16, %v724_v23  ;;  %v665_v26 = vadd.s32 4294967295, %v724_v23  ;;  %168 = vadd.xlane.f32.xlu2 %v167_v21  ;;  %162 = vadd.xlane.f32.xlu1 %v161_v22  ;;  %v925_v21 = vmov 1.0   ;;  %p861_p0 = pneg %p860_p13 }
  0x29   : > { %v246_v27 = vsel %vm242_vm1, %v664_v20, %v722_v16  ;;  %156 = vadd.xlane.f32.xlu0 %v155_v24 }
  0x2a   : > { %vm243_vm2 = vcmp.gt.s32.totalorder %v241_v25, %v1007_v2  ;;  %v248_v28 = vadd.s32 1, %v246_v27  ;;  %p866_p5 = pnand %p865_p3, %p861_p0 }
  0x2b   : > { %v247_v30 = vsel %vm243_vm2, %v665_v26, %v724_v23 }
  0x2c   : > { %v249_v32 = vadd.s32 1, %v247_v30  ;;  %v250_v33 = vmul.u32 16, %v248_v28 }
  0x2e   : > { %v251_v35 = vmul.u32 16, %v249_v32  ;;  %vm252_vm3 = vcmp.le.s32.totalorder %v250_v33, %v1004_v1 }
  0x2f   : > { %v254_v37 = vsel %vm252_vm3, %v248_v28, %v246_v27  ;;  %v289_v28 = vstv %s1137_s19 }
  0x30   : > { %vm253_vm4 = vcmp.le.s32.totalorder %v251_v35, %v1007_v2  ;;  %v256_v38 = vmul.u32 16, %v254_v37  ;;  %v264_v39 = vcvt.s32.f32 %v254_v37  ;;  %174 = vadd.xlane.f32.xlu1 %v173_v34 }
  0x31   : > { %v255_v40 = vsel %vm253_vm4, %v249_v32, %v247_v30  ;;  %171 = vadd.xlane.f32.xlu0 %v170_v36 }
  0x32   : > { %v257_v41 = vmul.u32 16, %v255_v40  ;;  %v265_v42 = vcvt.s32.f32 %v255_v40  ;;  %v258_v43 = vsub.s32 %v1004_v1, %v256_v38  ;;  %v668_v44 = vadd.f32 -7.5, %v264_v39 }
  0x33   : > { %v276_v1 = vstv %s218_s12 }
  0x34   : > { %v259_v46 = vsub.s32 %v1007_v2, %v257_v41  ;;  %v669_v47 = vadd.f32 -7.5, %v265_v42  ;;  %v260_v48 = vcvt.s32.f32 %v258_v43  ;;  %v1080_v50 = vmul.f32 %v668_v44, %v284_v45 }
  0x35   : > { %v272_v54 = vmul.f32 %v668_v44, %v271_v49 }
  0x36   : > { %v261_v51 = vcvt.s32.f32 %v259_v46  ;;  %v1082_v52 = vmul.f32 %v669_v47, %v284_v45  ;;  %v666_v53 = vadd.f32 -7.5, %v260_v48  ;;  %v273_v58 = vmul.f32 %v669_v47, %v271_v49 }
  0x38   : > { %v667_v57 = vadd.f32 -7.5, %v261_v51  ;;  %v269_v59 = vmul.f32 %v666_v53, %v268_v55  ;;  %v1086_v60 = vmul.f32 %v666_v53, %v281_v56 }
  0x3a   : > { %v270_v61 = vmul.f32 %v667_v57, %v268_v55  ;;  %v283_v62 = vmul.f32 %v667_v57, %v281_v56  ;;  %v274_v63 = vadd.f32 %v272_v54, %v269_v59  ;;  %v287_v48 = vadd.f32 %v1080_v50, %v1086_v60 }
  0x3c   : > { %v275_v2 = vadd.f32 %v273_v58, %v270_v61  ;;  %v277_v3 = vadd.f32 %v276_v1, %v274_v63  ;;  %v290_v53 = vadd.f32 %v289_v28, %v287_v48 }
  0x3e   : > { %v278_v7 = vadd.f32 %v276_v1, %v275_v2  ;;  %v1088_v8 = vadd.f32 7.5, %v277_v3 }
  0x40   : > { %v1090_v9 = vadd.f32 7.5, %v278_v7  ;;  %v670_v11 = vmax.f32 %v1088_v8, 0.0 }
  0x42   : > { %v673_v12 = vmax.f32 %v1090_v9, 0.0  ;;  %v671_v13 = vmin.f32 %v670_v11, 15.0  ;;  %v735_v48 = vcvt.f32.s32 %v1090_v9 }
  0x44   : > { %v674_v16 = vmin.f32 %v673_v12, 15.0  ;;  %v759_v19 = vcvt.f32.s32 %v671_v13  ;;  %v1148_v12 = vadd.f32 7.5, %v290_v53 }
  0x46   : > { %v762_v20 = vcvt.f32.s32 %v674_v16  ;;  %vm337_vm5 = vcmp.eq.s32.totalorder %v1098_v18, %v759_v19  ;;  %vm335_vm6 = vcmp.eq.s32.totalorder %v1093_v10, %v759_v19  ;;  %v676_v19 = vmax.f32 %v1148_v12, 0.0 }
  0x47   : > { %717 = vmatpush.msk.msra.mxu2 %vm337_vm5, %v925_v21  ;;  %690 = vmatpush.msk.msra.mxu0 %vm337_vm5, %v925_v21 }
  0x48   : > { %vm338_vm7 = vcmp.eq.s32.totalorder %v1098_v18, %v762_v20  ;;  %vm336_vm8 = vcmp.eq.s32.totalorder %v1093_v10, %v762_v20 }
  0x49   : > { %719 = vmatpush.msk.msra.mxu3 %vm338_vm7, %v925_v21  ;;  %718 = vmatpush.msk.msra.mxu2 %vm335_vm6, %v925_v21 }
  0x4a   : > { %700 = vmatpush.msk.msra.mxu1 %vm338_vm7, %v925_v21  ;;  %696 = vmatmul.msk.f32.vlgmr.msra.gmra.mxu2 %vm151_vm0, %v1016_v4 }
  0x4b   : > { %720 = vmatpush.msk.msra.mxu3 %vm336_vm8, %v925_v21  ;;  %691 = vmatpush.msk.msra.mxu0 %vm335_vm6, %v925_v21 }
  0x4c   : > { %706 = vmatmul.msk.f32.vlgmr.msra.gmra.mxu3 %vm151_vm0, %v1016_v4  ;;  %701 = vmatpush.msk.msra.mxu1 %vm336_vm8, %v925_v21 }
  0x4d   : > { %702 = vmatmul.msk.f32.vlgmr.msra.gmra.mxu1 %vm151_vm0, %v1022_v6  ;;  %692 = vmatmul.msk.f32.vlgmr.msra.gmra.mxu0 %vm151_vm0, %v1022_v6 }
  0x52   : > { %697 = vmatmul.msk.f32.gmra.mxu2 %vm151_vm0, %v1032_v14 }
  0x54   : > { %707 = vmatmul.msk.f32.gmra.mxu3 %vm151_vm0, %v1032_v14 }
  0x55   : > { %703 = vmatmul.msk.f32.gmra.mxu1 %vm151_vm0, %v1038_v17  ;;  %693 = vmatmul.msk.f32.gmra.mxu0 %vm151_vm0, %v1038_v17 }
  0x5a   : > { %698 = vmatmul.msk.f32.gmra.mxu2 %vm151_vm0, %v1059_v31 }
  0x5c   : > { %708 = vmatmul.msk.f32.gmra.mxu3 %vm151_vm0, %v1059_v31 }
  0x5d   : > { %704 = vmatmul.msk.f32.gmra.mxu1 %vm151_vm0, %v1019_v5  ;;  %694 = vmatmul.msk.f32.gmra.mxu0 %vm151_vm0, %v1019_v5  ;;  %v926_v5 = vmov 0  }
  0x5e   : > { %828 = vset.pattern.permute.xlu2 %v926_v5  ;;  %829 = vset.pattern.permute.xlu0 %v926_v5 }
  0x62   : > { %699 = vmatmul.msk.f32.gmra.mxu2 %vm151_vm0, %v1054_v29 }
  0x64   : > { %709 = vmatmul.msk.f32.gmra.mxu3 %vm151_vm0, %v1054_v29 }
  0x65   : > { %705 = vmatmul.msk.f32.gmra.mxu1 %vm151_vm0, %v1035_v15  ;;  %695 = vmatmul.msk.f32.gmra.mxu0 %vm151_vm0, %v1035_v15  ;;  %v288_v15 = vadd.f32 %v1082_v52, %v283_v62 }
  0x67   : > { %v291_v32 = vadd.f32 %v289_v28, %v288_v15 }
  0x69   : > { %v1146_v7 = vadd.f32 7.5, %v291_v32 }
  0x6b   : > { %v679_v13 = vmax.f32 %v1146_v7, 0.0 }
  0x6d   : > { %v680_v21 = vmin.f32 %v679_v13, 15.0 }
  0x6f   : > { %v768_v5 = vcvt.f32.s32 %v680_v21 }
  0x71   : > { %vm348_vm13 = vcmp.eq.s32.totalorder %v1093_v10, %v768_v5  ;;  %vm350_vm14 = vcmp.eq.s32.totalorder %v1098_v18, %v768_v5 }
  0x93   : > { %v166_v0 = vpop.xlane.xlu2 %165  ;;  %v160_v4 = vpop.xlane.xlu1 %159 }
  0x94   : > { %v154_v6 = vpop.xlane.xlu0 %153 }
  0x9b   : > { %v169_v14 = vpop.xlane.xlu2 %168  ;;  %v163_v17 = vpop.xlane.xlu1 %162 }
  0x9c   : > { %v190_v22 = vadd.f32 %v169_v14, %v166_v0  ;;  %v183_v23 = vadd.f32 %v163_v17, %v160_v4  ;;  %v157_v24 = vpop.xlane.xlu0 %156  ;;  %v677_v4 = vmin.f32 %v676_v19, 15.0 }
  0x9d   : > { %v176_v25 = vadd.f32 %v157_v24, %v154_v6 }
  0x9e   : > { %v191_v26 = vrot.slane %v190_v22, 4  ;;  %v184_v27 = vrot.slane %v183_v23, 4  ;;  %v765_v14 = vcvt.f32.s32 %v677_v4 }
  0x9f   : > { %v177_v29 = vrot.slane %v176_v25, 4 }
  0xa0   : > { %v192_v30 = vadd.f32 %v191_v26, %v190_v22  ;;  %v185_v31 = vadd.f32 %v184_v27, %v183_v23  ;;  %vm347_vm15 = vcmp.eq.s32.totalorder %v1093_v10, %v765_v14  ;;  %vm349_vm0 = vcmp.eq.s32.totalorder %v1098_v18, %v765_v14 }
  0xa1   : > { %v178_v33 = vadd.f32 %v177_v29, %v176_v25  ;;  %v927_v23 = vmov 0.0  }
  0xa2   : > { %v193_v34 = vrot.slane %v192_v30, 2  ;;  %v186_v35 = vrot.slane %v185_v31, 2  ;;  %v687_v24 = vsel %vm348_vm13, 1.0, %v927_v23  ;;  %v689_v25 = vsel %vm350_vm14, 1.0, %v927_v23 }
  0xa3   : > { %v179_v36 = vrot.slane %v178_v33, 2  ;;  %v175_v37 = vpop.xlane.xlu1 %174  ;;  %v686_v27 = vsel %vm347_vm15, 1.0, %v927_v23  ;;  %v688_v15 = vsel %vm349_vm0, 1.0, %v927_v23  ;;  %v730_v23 = vand.u32 2147483648, %v1088_v8 }
  0xa4   : > { %v187_v38 = vadd.f32 %v186_v35, %v185_v31  ;;  %v172_v39 = vpop.xlane.xlu0 %171  ;;  %v194_v42 = vadd.f32 %v193_v34, %v192_v30 }
  0xa5   : > { %v180_v40 = vadd.f32 %v179_v36, %v178_v33  ;;  %v197_v41 = vadd.f32 %v175_v37, %v172_v39 }
  0xa6   : > { %v188_v43 = vrot.slane %v187_v38, 1  ;;  %v195_v47 = vrot.slane %v194_v42, 1 }
  0xa7   : > { %v181_v44 = vrot.slane %v180_v40, 1  ;;  %v198_v45 = vrot.slane %v197_v41, 4 }
  0xa8   : > { %v189_v49 = vadd.f32 %v188_v43, %v187_v38  ;;  %v196_v55 = vadd.f32 %v195_v47, %v194_v42 }
  0xa9   : > { %v199_v46 = vadd.f32 %v198_v45, %v197_v41  ;;  %v182_v51 = vadd.f32 %v181_v44, %v180_v40 }
  0xab   : > { %v200_v52 = vrot.slane %v199_v46, 2  ;;  %v205_v56 = vsel %vm204_vm9, %v182_v51, %v189_v49 }
  0xac   : > { %v207_v59 = vsel %vm206_vm10, %v205_v56, %v196_v55 }
  0xad   : > { %v201_v54 = vadd.f32 %v200_v52, %v199_v46 }
  0xaf   : > { %v202_v57 = vrot.slane %v201_v54, 1 }
  0xb1   : > { %v203_v58 = vadd.f32 %v202_v57, %v201_v54 }
  0xb3   : > { %v209_v61 = vsel %vm208_vm11, %v207_v59, %v203_v58  ;;  %v727_v58 = vcvt.f32.s32 %v1088_v8 }
  0xb4   : > { %v210_v62 = vmul.f32 0.00390625, %v209_v61  ;;  %v736_v61 = vcvt.s32.f32 %v735_v48 }
  0xb5   : > { %v728_v19 = vcvt.s32.f32 %v727_v58 }
  0xb6   : > { %212 = vst.msk [vmem:[#allocation2] sm:$0xf] %vm211_vm12, %v210_v62  ;;  %v751_v62 = vcvt.f32.s32 %v1146_v7  ;;  %v737_v21 = vand.u32 2147483647, %v736_v61 }
  0xb8   : > { %v752_v4 = vcvt.s32.f32 %v751_v62 }
  0xbd   : > { %v547_v50 = vld [vmem:[#allocation2] sm:$0xf] }
  0xbe   : > { %554 = vperm.xlu2 %828, %v547_v50  }
  0xca   : > { %v442_v60 = vpop.f32.mrf.mxu1  ;;  %v401_v63 = vpop.f32.mrf.mxu0 }
  0xcb   : > { %v467_v29 = vmul.f32 %v687_v24, %v442_v60  ;;  %v466_v33 = vmul.f32 %v686_v27, %v401_v63 }
  0xcd   : > { %v413_v2 = vpop.f32.mrf.mxu2 }
  0xce   : > { %v502_v40 = vmul.f32 %v686_v27, %v413_v2  ;;  %v733_v2 = vand.u32 2147483647, %v1090_v9 }
  0xcf   : > { %v454_v1 = vpop.f32.mrf.mxu3 }
  0xd0   : > { %v503_v37 = vmul.f32 %v687_v24, %v454_v1  ;;  %vm1164_vm1 = vcmp.lt.f32.partialorder %v733_v2, 8388608.0 }
  0xd2   : > { %v445_v3 = vpop.f32.mrf.mxu1  ;;  %v404_v11 = vpop.f32.mrf.mxu0 }
  0xd3   : > { %v469_v30 = vmul.f32 %v689_v25, %v445_v3  ;;  %v468_v34 = vmul.f32 %v688_v15, %v404_v11  ;;  %v743_v3 = vcvt.f32.s32 %v1148_v12 }
  0xd5   : > { %v416_v20 = vpop.f32.mrf.mxu2  ;;  %v477_v39 = vadd.f32 %v469_v30, %v467_v29  ;;  %v470_v43 = vadd.f32 %v468_v34, %v466_v33 }
  0xd6   : > { %v504_v41 = vmul.f32 %v688_v15, %v416_v20 }
  0xd7   : > { %v457_v16 = vpop.f32.mrf.mxu3  ;;  %v478_v49 = vrot.slane %v477_v39, 4  ;;  %v471_v55 = vrot.slane %v470_v43, 4 }
  0xd8   : > { %v505_v38 = vmul.f32 %v689_v25, %v457_v16  ;;  %v506_v54 = vadd.f32 %v504_v41, %v502_v40 }
  0xd9   : > { %v479_v50 = vadd.f32 %v478_v49, %v477_v39  ;;  %v472_v11 = vadd.f32 %v471_v55, %v470_v43  ;;  %v746_v39 = vand.u32 2147483648, %v1148_v12 }
  0xda   : > { %v448_v0 = vpop.f32.mrf.mxu1  ;;  %v407_v6 = vpop.f32.mrf.mxu0  ;;  %v513_v47 = vadd.f32 %v505_v38, %v503_v37  ;;  %v507_v1 = vrot.slane %v506_v54, 4  ;;  %v741_v38 = vand.u32 2147483647, %v1148_v12 }
  0xdb   : > { %v485_v31 = vmul.f32 %v687_v24, %v448_v0  ;;  %v484_v35 = vmul.f32 %v686_v27, %v407_v6  ;;  %v738_v0 = vand.u32 2147483648, %v1090_v9  ;;  %v480_v6 = vrot.slane %v479_v50, 2 }
  0xdc   : > { %v514_v59 = vrot.slane %v513_v47, 4  ;;  %vm742_vm4 = vcmp.lt.f32.partialorder %v741_v38, 8388608.0 }
  0xdd   : > { %v419_v22 = vpop.f32.mrf.mxu2  ;;  %v739_v30 = vor.u32 %v738_v0, %v737_v21  ;;  %v481_v33 = vadd.f32 %v480_v6, %v479_v50 }
  0xde   : > { %v520_v51 = vmul.f32 %v686_v27, %v419_v22  ;;  %v515_v20 = vadd.f32 %v514_v59, %v513_v47  ;;  %v508_v22 = vadd.f32 %v507_v1, %v506_v54 }
  0xdf   : > { %v460_v17 = vpop.f32.mrf.mxu3 }
  0xe0   : > { %v521_v44 = vmul.f32 %v687_v24, %v460_v17  ;;  %v725_v17 = vand.u32 2147483647, %v1088_v8  ;;  %v516_v29 = vrot.slane %v515_v20, 2  ;;  %v509_v37 = vrot.slane %v508_v22, 2 }
  0xe2   : > { %v451_v26 = vpop.f32.mrf.mxu1  ;;  %v410_v28 = vpop.f32.mrf.mxu0  ;;  %v517_v43 = vadd.f32 %v516_v29, %v515_v20  ;;  %vm726_vm2 = vcmp.lt.f32.partialorder %v725_v17, 8388608.0  ;;  %v510_v49 = vadd.f32 %v509_v37, %v508_v22 }
  0xe3   : > { %v487_v32 = vmul.f32 %v689_v25, %v451_v26  ;;  %v486_v36 = vmul.f32 %v688_v15, %v410_v28  ;;  %v473_v26 = vrot.slane %v472_v11, 2  ;;  %v729_v28 = vand.u32 2147483647, %v728_v19 }
  0xe4   : > { %v511_v61 = vrot.slane %v510_v49, 1 }
  0xe5   : > { %v495_v18 = vadd.f32 %v487_v32, %v485_v31  ;;  %v422_v42 = vpop.f32.mrf.mxu2  ;;  %v488_v45 = vadd.f32 %v486_v36, %v484_v35  ;;  %v753_v31 = vand.u32 2147483647, %v752_v4  ;;  %v754_v32 = vand.u32 2147483648, %v1146_v7 }
  0xe6   : > { %v522_v53 = vmul.f32 %v688_v15, %v422_v42  ;;  %v749_v36 = vand.u32 2147483647, %v1146_v7  ;;  %v731_v42 = vor.u32 %v730_v23, %v729_v28  ;;  %v512_v2 = vadd.f32 %v511_v61, %v510_v49 }
  0xe7   : > { %v463_v10 = vpop.f32.mrf.mxu3  ;;  %v496_v52 = vrot.slane %v495_v18, 4  ;;  %v489_v56 = vrot.slane %v488_v45, 4 }
  0xe8   : > { %v523_v46 = vmul.f32 %v689_v25, %v463_v10  ;;  %v524_v63 = vadd.f32 %v522_v53, %v520_v51  ;;  %v744_v25 = vcvt.s32.f32 %v743_v3  ;;  %vm750_vm3 = vcmp.lt.f32.partialorder %v749_v36, 8388608.0 }
  0xe9   : > { %v497_v60 = vadd.f32 %v496_v52, %v495_v18  ;;  %v490_v13 = vadd.f32 %v489_v56, %v488_v45  ;;  %v474_v18 = vadd.f32 %v473_v26, %v472_v11  ;;  %v755_v45 = vor.u32 %v754_v32, %v753_v31 }
  0xea   : > { %v531_v57 = vadd.f32 %v523_v46, %v521_v44  ;;  %v525_v14 = vrot.slane %v524_v63, 4  ;;  %v745_v10 = vand.u32 2147483647, %v744_v25  ;;  %v740_v44 = vsel %vm1164_vm1, %v739_v30, %v1090_v9 }
  0xeb   : > { %v498_v5 = vrot.slane %v497_v60, 2  ;;  %v491_v27 = vrot.slane %v490_v13, 2  ;;  %v482_v46 = vrot.slane %v481_v33, 1  ;;  %v475_v52 = vrot.slane %v474_v18, 1 }
  0xec   : > { %v532_v16 = vrot.slane %v531_v57, 4  ;;  %v526_v35 = vadd.f32 %v525_v14, %v524_v63  ;;  %v747_v51 = vor.u32 %v746_v39, %v745_v10  ;;  %v732_v55 = vsel %vm726_vm2, %v731_v42, %v1088_v8 }
  0xed   : > { %v499_v34 = vadd.f32 %v498_v5, %v497_v60  ;;  %v492_v40 = vadd.f32 %v491_v27, %v490_v13  ;;  %v518_v56 = vrot.slane %v517_v43, 1  ;;  %vm299_vm5 = vcmp.ge.f32.partialorder %v740_v44, 0.0 }
  0xee   : > { %v533_v15 = vadd.f32 %v532_v16, %v531_v57  ;;  %v527_v48 = vrot.slane %v526_v35, 2  ;;  %v756_v57 = vsel %vm750_vm3, %v755_v45, %v1146_v7  ;;  %vm301_vm6 = vcmp.le.f32.partialorder %v740_v44, 15.0 }
  0xef   : > { %v500_v47 = vrot.slane %v499_v34, 1  ;;  %v493_v53 = vrot.slane %v492_v40, 1  ;;  %v483_v9 = vadd.f32 %v482_v46, %v481_v33  ;;  %v748_v62 = vsel %vm742_vm4, %v747_v51, %v1148_v12  ;;  %vm303_vm12 = vmand %vm299_vm5, %vm301_vm6 }
  0xf0   : > { %v534_v41 = vrot.slane %v533_v15, 2  ;;  %v528_v59 = vadd.f32 %v527_v48, %v526_v35  ;;  %vm298_vm7 = vcmp.ge.f32.partialorder %v732_v55, 0.0  ;;  %vm300_vm8 = vcmp.le.f32.partialorder %v732_v55, 15.0 }
  0xf1   : > { %v501_v58 = vadd.f32 %v500_v47, %v499_v34  ;;  %v476_v50 = vadd.f32 %v475_v52, %v474_v18  ;;  %v494_v60 = vadd.f32 %v493_v53, %v492_v40  ;;  %vm305_vm13 = vcmp.ge.f32.partialorder %v756_v57, 0.0  ;;  %vm302_vm14 = vmand %vm298_vm7, %vm300_vm8 }
  0xf2   : > { %v535_v54 = vadd.f32 %v534_v41, %v533_v15  ;;  %v519_v8 = vadd.f32 %v518_v56, %v517_v43  ;;  %v529_v7 = vrot.slane %v528_v59, 1  ;;  %vm304_vm15 = vcmp.ge.f32.partialorder %v748_v62, 0.0  ;;  %vm307_vm0 = vmand %vm303_vm12, %vm305_vm13 }
  0xf3   : > { %v540_v1 = vsel %vm204_vm9, %v483_v9, %v501_v58  ;;  %vm309_vm1 = vcmp.le.f32.partialorder %v756_v57, 15.0  ;;  %v539_v3 = vsel %vm204_vm9, %v476_v50, %v494_v60  ;;  %vm306_vm2 = vmand %vm302_vm14, %vm304_vm15  ;;  %vm308_vm3 = vcmp.le.f32.partialorder %v748_v62, 15.0 }
  0xf4   : > { %v536_v63 = vrot.slane %v535_v54, 1  ;;  %v543_v11 = vsel %vm206_vm10, %v540_v1, %v519_v8  ;;  %vm311_vm4 = vmand %vm307_vm0, %vm309_vm1  ;;  %v530_v13 = vadd.f32 %v529_v7, %v528_v59  ;;  %v542_v16 = vsel %vm206_vm10, %v539_v3, %v512_v2 }
  0xf5   : > { %vm310_vm5 = vmand %vm306_vm2, %vm308_vm3  ;;  %vm562_vm9 = vcmask 1043456  }
  0xf6   : > { %v537_v12 = vadd.f32 %v536_v63, %v535_v54  ;;  %v545_v0 = vsel %vm208_vm11, %v542_v16, %v530_v13 }
  0xf8   : > { %v546_v19 = vsel %vm208_vm11, %v543_v11, %v537_v12 }
 0x118   : > { %v555_v20 = vpop.permute.xlu2 %554 }
 0x119   : > { %v558_v21 = vsel %vm311_vm4, %v546_v19, %v555_v20  ;;  %v557_v6 = vsel %vm310_vm5, %v545_v0, %v555_v20 }
 0x11a   : > { %v561_v4 = vrot.slane %v558_v21, 4 }
 0x11c   : > { %v563_v5 = vsel %vm562_vm9, %v557_v6, %v561_v4 }
 0x11d   : > { %565 = vst [vmem:[%s132_s16] sm:$0xff] %v563_v5 }
 0x11e   : > { %869 = shalt.err (!%p866_p5)
}
 0x11f   : > { %769 = dma.vmem_to_hbm [thread:$0]  (%p986_p4), %s583_s30, 128, %s585_s3, %s567_s4  }
 0x120 PF: > { %p775_p6 = scmp.ge.s32.totalorder %s922_s18, 2  ;;  %s596_s12 = sand.u32 1, %s902_s13  }
 0x121   : > { %s597_s0 = scalar_lea.sflag [#allocation6], %s596_s12 }
 0x122   : > { %p772_p7 = pnand %p775_p6, %p993_p8 }
 0x124   : > { %p773_p9 = pneg %p772_p7 }
 0x126   : > { %897 = dma.done.wait (%p773_p9), %s597_s0, 128  }
 0x127   : > { %899 = vsyncadd (%p773_p9), %s597_s0, 4294967168  ;;  %s23_s18 = sadd.s32 1, %s922_s18   ;;  %s1232_s13 = smov %s906_s14 }
 0x128   : > { %p20_p10 = scmp.ge.s32.totalorder %s23_s18, 4   ;;  %s1233_s14 = smov %s910_s15 }
 0x129   : > { %s1234_s15 = smov %s999_s25  ;;  %s1235_s16 = smov %s918_s17 }
 0x12a   : > { %s1236_s17 = smov %s1238_s20  ;;  %22 = sbr.rel (!%p20_p10) target bundleno = 10 (0xa), region = 63 }
 0x12f   :  { %603 = vsyncpa [#allocation6], 1 }
 0x130   :  { %605 = vsyncpa [#allocation6 + $0x1], 1 }

</bundles_post_ra>
